<compile_context>
chip_gen: v7x
topology: tpu7x:2x2x1
jax: 0.10.0
libtpu: 0.0.40
codegen_flags: <defaults>
</compile_context>

<pallas_src>
import random

import numpy as np
import jax
import jax.numpy as jnp
from jax.experimental import pallas as pl
from jax.experimental.pallas import tpu as pltpu


def _round_up(x, m):
    return ((x + m - 1) // m) * m


def _choose_tiles(B, U, D, *, tm=512, tn=1024, tk=2048):
    """Pick tile sizes + padded dims. tm mult of 32 (int8), tn/tk mult of 128."""
    tm = min(tm, _round_up(B, 32))
    tn = min(tn, _round_up(D, 128))
    tk = min(tk, _round_up(U, 128))
    Bp = _round_up(B, tm)
    Dp = _round_up(D, tn)
    # Make sure at least one parallel grid axis has >= 2 blocks when the
    # problem allows it, so v7x's two TensorCores are both used.
    if Bp // tm == 1 and Dp // tn == 1:
        if B > 32 and tm >= 64:
            tm //= 2
        elif D > 128 and tn >= 256:
            tn //= 2
    Bp = _round_up(B, tm)
    Dp = _round_up(D, tn)
    Up = _round_up(U, tk)
    return tm, tn, tk, Bp, Dp, Up


def mean_agg_kernel(mask_ref, embed_ref, inv_ref, out_ref):
    # mask_ref:  [tm, tk] int8  (0/1 adjacency tile)
    # embed_ref: [tk, tn] bf16  (neighbor-feature tile)
    # inv_ref:   [tm, 1]  f32   (precomputed 1/num_neigh per row)
    # out_ref:   [tm, tn] f32   (resident across k: acts as the accumulator)
    k = pl.program_id(2)

    @pl.when(k == 0)
    def _():
        out_ref[...] = jnp.zeros_like(out_ref)

    # i8 -> f32 -> bf16: both steps are guaranteed Mosaic conversions; the
    # 0/1 values are exact in bf16 and the cast hides under the MXU.
    m = mask_ref[...].astype(jnp.float32).astype(jnp.bfloat16)
    out_ref[...] += jnp.dot(m, embed_ref[...],
                            preferred_element_type=jnp.float32)

    @pl.when(k == pl.num_programs(2) - 1)
    def _():
        out_ref[...] *= inv_ref[...]   # exact reciprocal computed outside


def _mean_agg_call(mask_p, embed_p, inv_p, *, tm, tn, tk):
    """All operands already padded to tile multiples. Returns [Bp, Dp] f32."""
    Bp, Up = mask_p.shape
    Up2, Dp = embed_p.shape
    assert Up == Up2 and inv_p.shape == (Bp, 1)
    grid = (Bp // tm, Dp // tn, Up // tk)

    return pl.pallas_call(
        mean_agg_kernel,
        out_shape=jax.ShapeDtypeStruct((Bp, Dp), jnp.float32),
        grid_spec=pltpu.PrefetchScalarGridSpec(
            num_scalar_prefetch=0,
            grid=grid,
            in_specs=[
                pl.BlockSpec((tm, tk), lambda i, j, k: (i, k)),   # int8 mask
                pl.BlockSpec((tk, tn), lambda i, j, k: (k, j)),   # bf16 embed
                pl.BlockSpec((tm, 1), lambda i, j, k: (i, 0)),    # f32 1/count
            ],
            out_specs=pl.BlockSpec((tm, tn), lambda i, j, k: (i, j)),
        ),
        compiler_params=pltpu.CompilerParams(
            dimension_semantics=("parallel", "parallel", "arbitrary"),
            vmem_limit_bytes=32 * 1024 * 1024,
        ),
    )(mask_p, embed_p, inv_p)


def mean_aggregate(mask, embed, num_neigh=None, *, tm=512, tn=1024, tk=2048):
    """Generic wrapper: mask [B, U] 0/1 (any dtype), embed [U, D].
    Returns [B, D] f32 row-mean of neighbor embeddings."""
    B, U = mask.shape
    U2, D = embed.shape
    assert U == U2
    tm, tn, tk, Bp, Dp, Up = _choose_tiles(B, U, D, tm=tm, tn=tn, tk=tk)

    mask_i8 = mask.astype(jnp.int8)                     # 1 byte/elem on the wire
    if num_neigh is None:
        num_neigh = jnp.sum(mask_i8, axis=1, dtype=jnp.float32).reshape(B, 1)
    inv = 1.0 / jnp.maximum(num_neigh.astype(jnp.float32).reshape(B, 1), 1.0)

    mask_p = jnp.pad(mask_i8, ((0, Bp - B), (0, Up - U)))
    embed_p = jnp.pad(embed.astype(jnp.bfloat16), ((0, Up - U), (0, Dp - D)))
    inv_p = jnp.pad(inv, ((0, Bp - B), (0, 0)), constant_values=1.0)

    out_p = _mean_agg_call(mask_p, embed_p, inv_p, tm=tm, tn=tn, tk=tk)
    return out_p[:B, :D]


class MeanAggregatorPallas:
    """JAX/Pallas port of graphsage.aggregators.MeanAggregator."""

    def __init__(self, features_fn, gcn=False):
        self.features = features_fn  # maps np.int64 node ids -> features
        self.gcn = gcn

    def forward(self, nodes, to_neighs, num_sample=10):
        _set = set
        if num_sample is not None:
            _sample = random.sample
            samp_neighs = [
                _set(_sample(sorted(to_neigh), num_sample))
                if len(to_neigh) >= num_sample else to_neigh
                for to_neigh in to_neighs
            ]
        else:
            samp_neighs = to_neighs
        if self.gcn:
            samp_neighs = [samp_neigh | {nodes[i]}
                           for i, samp_neigh in enumerate(samp_neighs)]

        unique_nodes_list = list(set.union(*samp_neighs))
        unique_nodes = {n: i for i, n in enumerate(unique_nodes_list)}

        embed_matrix = self.features(np.asarray(unique_nodes_list, dtype=np.int64))
        embed = jnp.asarray(embed_matrix, dtype=jnp.float32)

        B, U = len(samp_neighs), len(unique_nodes_list)
        D = int(embed.shape[1])
        tm, tn, tk, Bp, Dp, Up = _choose_tiles(B, U, D)

        # Host-built mask directly at padded shape, int8: no device-side pad or
        # bf16 cast copies of the dominant B*U operand.
        mask_np = np.zeros((Bp, Up), dtype=np.int8)
        column_indices = [unique_nodes[n]
                          for samp_neigh in samp_neighs for n in samp_neigh]
        row_indices = [i for i in range(len(samp_neighs))
                       for _ in range(len(samp_neighs[i]))]
        mask_np[row_indices, column_indices] = 1

        # Exact neighbor counts are known on the host (each samp_neigh is a set).
        counts = np.asarray([len(s) for s in samp_neighs], dtype=np.float32)
        inv_np = np.ones((Bp, 1), dtype=np.float32)
        inv_np[:B, 0] = 1.0 / np.maximum(counts, 1.0)  # clamp empty rows (PyTorch would NaN)

        # Embed is the small operand: pad + bf16 cast on device.
        embed_p = jnp.pad(embed.astype(jnp.bfloat16), ((0, Up - U), (0, Dp - D)))

        # stash for reference checking in __main__
        self._dbg_mask = mask_np[:B, :U]
        self._dbg_embed = np.asarray(embed_matrix, dtype=np.float32)

        out_p = _mean_agg_call(jnp.asarray(mask_np), embed_p, jnp.asarray(inv_np),
                               tm=tm, tn=tn, tk=tk)
        return out_p[:B, :D]


if __name__ == "__main__":
    # Deterministic synthetic setup (small shapes).
    random.seed(0)
    NUM_NODES = 64     # total nodes in the graph
    FEAT_DIM = 32      # feature / hidden dim
    BATCH = 8          # nodes in the batch
    NUM_SAMPLE = 10

    key = jax.random.PRNGKey(0)
    feature_table = jax.random.normal(key, (NUM_NODES, FEAT_DIM), dtype=jnp.float32)

    def features_fn(node_ids):
        return feature_table[jnp.asarray(node_ids)]

    # Deterministic random graph: each node gets 5..15 neighbors.
    to_neighs_all = []
    for n in range(NUM_NODES):
        k = random.randint(5, 15)
        neighs = set(random.sample(range(NUM_NODES), k))
        neighs.discard(n)
        if not neighs:
            neighs = {(n + 1) % NUM_NODES}
        to_neighs_all.append(neighs)

    nodes = list(range(BATCH))
    to_neighs = [to_neighs_all[n] for n in nodes]

    agg = MeanAggregatorPallas(features_fn, gcn=False)
    out = agg.forward(nodes, to_neighs, num_sample=NUM_SAMPLE)
    out = jax.block_until_ready(out)

    assert out.shape == (BATCH, FEAT_DIM)
    assert bool(jnp.all(jnp.isfinite(out)))

    # Reference check (same mask/embed path, plain f32 math).
    m = agg._dbg_mask.astype(np.float32)
    e = agg._dbg_embed
    cnt = np.maximum(m.sum(axis=1, keepdims=True), 1.0)
    ref = (m @ e) / cnt
    np.testing.assert_allclose(np.asarray(out), ref, rtol=2e-2, atol=2e-2)

    print("KERNEL_OK")
</pallas_src>

<mosaic_0001>
module attributes {stable_mosaic.version = 11 : i64} {
  func.func @mean_agg_kernel(%arg0: i32, %arg1: i32, %arg2: i32, %arg3: memref<32x128xi8, #tpu.memory_space<vmem>>, %arg4: memref<128x128xbf16, #tpu.memory_space<vmem>>, %arg5: memref<32x1xf32, #tpu.memory_space<vmem>>, %arg6: memref<32x128xf32, #tpu.memory_space<vmem>>) attributes {dimension_semantics = [#tpu.dimension_semantics<parallel>, #tpu.dimension_semantics<parallel>, #tpu.dimension_semantics<arbitrary>], iteration_bounds = array<i64: 1, 1, 1>, scalar_prefetch = 0 : i64, scratch_operands = 0 : i64, tpu.core_type = #tpu.core_type<tc>, window_params = [{transform_indices = @transform_0, window_bounds = array<i64: 32, 128>}, {transform_indices = @transform_1, window_bounds = array<i64: 128, 128>}, {transform_indices = @transform_2, window_bounds = array<i64: 32, 1>}, {transform_indices = @transform_3, window_bounds = array<i64: 32, 128>}]} {
    %c0_i32 = arith.constant 0 : i32
    %0 = arith.cmpi eq, %arg2, %c0_i32 : i32
    %1 = arith.extui %0 : i1 to i32
    %c0_i32_0 = arith.constant 0 : i32
    %2 = arith.cmpi ne, %1, %c0_i32_0 : i32
    scf.if %2 {
      %cst_10 = arith.constant 0.000000e+00 : f32
      %14 = vector.broadcast %cst_10 : f32 to vector<32x128xf32>
      %c0_11 = arith.constant 0 : index
      %c0_12 = arith.constant 0 : index
      %15 = vector.load %arg6[%c0_11, %c0_12] : memref<32x128xf32, #tpu.memory_space<vmem>>, vector<32x128xf32>
      tpu.vector_store %arg6[%c0_11, %c0_12], %14 {strides = array<i32>} : memref<32x128xf32, #tpu.memory_space<vmem>>, vector<32x128xf32>,
    } else {
    }
    %c0 = arith.constant 0 : index
    %c0_1 = arith.constant 0 : index
    %3 = vector.load %arg3[%c0, %c0_1] : memref<32x128xi8, #tpu.memory_space<vmem>>, vector<32x128xi8>
    %4 = arith.sitofp %3 : vector<32x128xi8> to vector<32x128xf32>
    %5 = arith.truncf %4 : vector<32x128xf32> to vector<32x128xbf16>
    %c0_2 = arith.constant 0 : index
    %c0_3 = arith.constant 0 : index
    %6 = vector.load %arg6[%c0_2, %c0_3] : memref<32x128xf32, #tpu.memory_space<vmem>>, vector<32x128xf32>
    %c0_4 = arith.constant 0 : index
    %c0_5 = arith.constant 0 : index
    %7 = vector.load %arg4[%c0_4, %c0_5] : memref<128x128xbf16, #tpu.memory_space<vmem>>, vector<128x128xbf16>
    %cst = arith.constant dense<0.000000e+00> : vector<32x128xf32>
    %8 = tpu.matmul %5, %7, %cst {dimension_numbers = #tpu.dot_dimension_numbers<[1], [0], [0], [1], [0, 0, 1, 1], [], []>} : vector<32x128xbf16>, vector<128x128xbf16>, vector<32x128xf32> -> vector<32x128xf32>
    %9 = arith.addf %6, %8 : vector<32x128xf32>
    %c0_6 = arith.constant 0 : index
    %c0_7 = arith.constant 0 : index
    %10 = vector.load %arg6[%c0_6, %c0_7] : memref<32x128xf32, #tpu.memory_space<vmem>>, vector<32x128xf32>
    tpu.vector_store %arg6[%c0_6, %c0_7], %9 {strides = array<i32>} : memref<32x128xf32, #tpu.memory_space<vmem>>, vector<32x128xf32>,
    %c0_i32_8 = arith.constant 0 : i32
    %11 = arith.cmpi eq, %arg2, %c0_i32_8 : i32
    %12 = arith.extui %11 : i1 to i32
    %c0_i32_9 = arith.constant 0 : i32
    %13 = arith.cmpi ne, %12, %c0_i32_9 : i32
    scf.if %13 {
      %c0_10 = arith.constant 0 : index
      %c0_11 = arith.constant 0 : index
      %14 = vector.load %arg6[%c0_10, %c0_11] : memref<32x128xf32, #tpu.memory_space<vmem>>, vector<32x128xf32>
      %c0_12 = arith.constant 0 : index
      %c0_13 = arith.constant 0 : index
      %15 = vector.load %arg5[%c0_12, %c0_13] : memref<32x1xf32, #tpu.memory_space<vmem>>, vector<32x1xf32>
      %16 = vector.broadcast %15 : vector<32x1xf32> to vector<32x128xf32>
      %17 = arith.mulf %14, %16 : vector<32x128xf32>
      %c0_14 = arith.constant 0 : index
      %c0_15 = arith.constant 0 : index
      %18 = vector.load %arg6[%c0_14, %c0_15] : memref<32x128xf32, #tpu.memory_space<vmem>>, vector<32x128xf32>
      tpu.vector_store %arg6[%c0_14, %c0_15], %17 {strides = array<i32>} : memref<32x128xf32, #tpu.memory_space<vmem>>, vector<32x128xf32>,
    } else {
    }
    return
  }
  func.func @transform_0(%arg0: i32, %arg1: i32, %arg2: i32) -> (i32, i32) {
    %c0_i32 = arith.constant 0 : i32
    return %arg0, %arg2 : i32, i32
  }
  func.func @transform_1(%arg0: i32, %arg1: i32, %arg2: i32) -> (i32, i32) {
    %c0_i32 = arith.constant 0 : i32
    return %arg2, %arg1 : i32, i32
  }
  func.func @transform_2(%arg0: i32, %arg1: i32, %arg2: i32) -> (i32, i32) {
    %c0_i32 = arith.constant 0 : i32
    %c0_i32_0 = arith.constant 0 : i32
    return %arg0, %c0_i32 : i32, i32
  }
  func.func @transform_3(%arg0: i32, %arg1: i32, %arg2: i32) -> (i32, i32) {
    %c0_i32 = arith.constant 0 : i32
    return %arg0, %arg1 : i32, i32
  }
}

</mosaic_0001>

<bundles_post_ra>
// kernel: tpu_custom_call.1
= control target key start
LH: loop header
LB: loop body
LE: loop exit
PB: predicated region body
PF: predicated region fallthrough
CT: control target
= control target key end

     0   :  { %8 = vsyncpa [#allocation3], 0  ;;  %s392_s0 = inlined_call_operand.vmem [shape: s8[32,128], index: 0, kind: input, shape index: {}]   ;;  %s393_s1 = inlined_call_operand.hbm [shape: bf16[128,128], index: 1, kind: input, shape index: {}]   ;;  %s394_s2 = inlined_call_operand.vmem [shape: f32[32,1], index: 2, kind: input, shape index: {}]   ;;  %s395_s3 = inlined_call_operand.hbm [shape: f32[32,128], index: 3, kind: output, shape index: {}]  }
   0x1   :  { %9 = vsyncpa [#allocation4], 0  ;;  %s326_s12 = smov [#allocation2]   ;;  %s278_s16 = scalar_lea.hbm %s393_s1, 1024 }
   0x2   :  { %s17_s13 = sshll.u32 %s326_s12, 4  ;;  %p279_p0 = scmp.ne.s32.totalorder %s393_s1, %s278_s16  ;;  %s18_s13 = int_to_ptr.vmem [resolvable:$true] %s17_s13 }
   0x3   :  { %p282_p1 = scmp.lt.u32.totalorder %s278_s16, %s393_s1 }
   0x5   :  { %p284_p2 = pnand %p282_p1, %p279_p0 }
   0x7   :  { %287 = shalt.err (!%p284_p2)
}
   0x8   :  { %s288_s21 = scalar_lea.vmem %s18_s13, 1024  ;;  %p293_p4 = scmp.lt.s32.totalorder %s18_s13, %s18_s13 }
   0x9   :  { %p289_p3 = scmp.ne.s32.totalorder %s18_s13, %s288_s21  ;;  %p294_p5 = scmp.lt.s32.totalorder %s288_s21, %s288_s21 }
   0xb   :  { %p295_p6 = por %p294_p5, %p293_p4 }
   0xd   :  { %p296_p7 = pnand %p295_p6, %p289_p3 }
   0xf   :  { %299 = shalt.err (!%p296_p7)
}
  0x10   :  { %s327_s22 = smov 64   ;;  %s328_s23 = smov 4  }
  0x11   :  { %23 = dma.hbm_to_vmem [thread:$0]  %s393_s1, 1024, %s18_s13, [#allocation3], %s327_s22, %s327_s22, %s328_s23  }
  0x12   :  { %322 = dma.done.wait [#allocation3], 1024  }
  0x13   :  { %323 = vsyncadd [#allocation3], 4294966272  ;;  %v329_v0 = vmov 0   ;;  %v270_v1 = vld [vmem:[#allocation2] sm:$0xff]   ;;  %v271_v2 = vld [vmem:[#allocation2 + $0x8] sm:$0xff]  }
  0x14   :  { %269 = vset.pattern.permute.xlu1 %v329_v0  ;;  %268 = vset.pattern.permute.xlu0 %v329_v0  ;;  %v272_v3 = vld [vmem:[#allocation2 + $0x10] sm:$0xff]   ;;  %v273_v4 = vld [vmem:[#allocation2 + $0x18] sm:$0xff]   ;;  %v38_v5 = vld [vmem:[%s392_s0] sm:$0xff]  ;;  %s330_s0 = smov [#allocation5]  }
  0x15   :  { %240 = vmatprep.subr.bf16.mxu0 %v270_v1  ;;  %v175_v6 = vld [vmem:[%s394_s2 + $0x10] sm:$0xff]  ;;  %v173_v7 = vld [vmem:[%s394_s2] sm:$0xff]  ;;  %v39_v8 = vunpack.c.l.s8.bf16 %v38_v5  ;;  %v176_v9 = vld [vmem:[%s394_s2 + $0x18] sm:$0xff]  ;;  %v40_v15 = vunpack.c.h.s8.bf16 %v38_v5 }
  0x16   :  { %241 = vmatpush3.bf16.msra.mxu0 %v270_v1  ;;  %189 = vperm.xlu1 %269, %v175_v6   ;;  %v174_v10 = vld [vmem:[%s394_s2 + $0x8] sm:$0xff]  ;;  %v274_v11 = vld [vmem:[#allocation2 + $0x20] sm:$0xff]   ;;  %v276_v13 = vld [vmem:[#allocation2 + $0x30] sm:$0xff]   ;;  %s210_s2 = sshll.u32 %s330_s0, 4  ;;  %s211_s2 = int_to_ptr.vmem [resolvable:$true] %s210_s2 }
  0x17   :  { %242 = vmatprep.subr.bf16.mxu0 %v271_v2  ;;  %179 = vperm.xlu0 %268, %v173_v7   ;;  %v275_v12 = vld [vmem:[#allocation2 + $0x28] sm:$0xff]   ;;  %v277_v14 = vld [vmem:[#allocation2 + $0x38] sm:$0xff]   ;;  %s300_s8 = scalar_lea.vmem %s211_s2, 512  ;;  %p305_p9 = scmp.lt.s32.totalorder %s211_s2, %s211_s2 }
  0x18   :  { %256 = vmatprep.mubr.bf16.mxu0 %v39_v8  ;;  %p301_p8 = scmp.ne.s32.totalorder %s211_s2, %s300_s8  ;;  %p306_p10 = scmp.lt.s32.totalorder %s300_s8, %s300_s8 }
  0x1a   :  { %243 = vmatpush3.bf16.msra.mxu0 %v271_v2  ;;  %194 = vperm.xlu1 %269, %v176_v9   ;;  %p307_p11 = por %p306_p10, %p305_p9 }
  0x1b   :  { %244 = vmatprep.subr.bf16.mxu0 %v272_v3  ;;  %184 = vperm.xlu0 %268, %v174_v10  }
  0x1c   :  { %p308_p12 = pnand %p307_p11, %p301_p8 }
  0x1e   :  { %245 = vmatpush3.bf16.msra.mxu0 %v272_v3 }
  0x1f   :  { %246 = vmatprep.subr.bf16.mxu0 %v273_v4 }
  0x22   :  { %247 = vmatpush3.bf16.msra.mxu0 %v273_v4 }
  0x23   :  { %248 = vmatprep.subr.bf16.mxu0 %v274_v11 }
  0x26   :  { %249 = vmatpush3.bf16.msra.mxu0 %v274_v11 }
  0x27   :  { %250 = vmatprep.subr.bf16.mxu0 %v275_v12 }
  0x2a   :  { %251 = vmatpush3.bf16.msra.mxu0 %v275_v12 }
  0x2b   :  { %252 = vmatprep.subr.bf16.mxu0 %v276_v13 }
  0x2e   :  { %253 = vmatpush3.bf16.msra.mxu0 %v276_v13 }
  0x2f   :  { %254 = vmatprep.subr.bf16.mxu0 %v277_v14 }
  0x32   :  { %255 = vmatpush3.bf16.msra.mxu0 %v277_v14 }
  0x35   :  { %257 = vmatmul.mubr.bf16.vlgmr.msra.gmra.mrb[0].mxu0 %v40_v15 }
  0x95   :  { %v190_v16 = vpop.permute.xlu1 %189 }
  0x96   :  { %v180_v17 = vpop.permute.xlu0 %179 }
  0x99   :  { %v195_v24 = vpop.permute.xlu1 %194 }
  0x9a   :  { %v185_v26 = vpop.permute.xlu0 %184 }
 0x108   :  { %v258_v18 = vpop.f32.mrb[0].mxu0 }
 0x109   :  { %v143_v19 = vpop.f32.mrb[1].mxu0  ;;  %v199_v22 = vmul.f32 %v258_v18, %v190_v16 }
 0x10a   :  { %v259_v20 = vpop.f32.mrb[2].mxu0  ;;  %v197_v23 = vmul.f32 %v180_v17, %v143_v19 }
 0x10b   :  { %v146_v21 = vpop.f32.mrb[3].mxu0  ;;  %203 = vst [vmem:[#allocation5 + $0x10] sm:$0xff] %v199_v22  ;;  %v200_v25 = vmul.f32 %v259_v20, %v195_v24 }
 0x10c   :  { %201 = vst [vmem:[#allocation5] sm:$0xff] %v197_v23  ;;  %v198_v27 = vmul.f32 %v185_v26, %v146_v21 }
 0x10d   :  { %204 = vst [vmem:[#allocation5 + $0x18] sm:$0xff] %v200_v25 }
 0x10e   :  { %202 = vst [vmem:[#allocation5 + $0x8] sm:$0xff] %v198_v27 }
 0x10f   :  { %311 = shalt.err (!%p308_p12)
}
 0x110   :  { %s312_s11 = scalar_lea.hbm %s395_s3, 512 }
 0x111   :  { %p313_p13 = scmp.ne.s32.totalorder %s395_s3, %s312_s11  ;;  %p316_p0 = scmp.lt.u32.totalorder %s312_s11, %s395_s3 }
 0x113   :  { %p318_p1 = pnand %p316_p0, %p313_p13 }
 0x115   :  { %321 = shalt.err (!%p318_p1)
}
 0x116   :  { %s331_s16 = smov 128   ;;  %s332_s17 = smov 8  }
 0x117   :  { %216 = dma.vmem_to_hbm [thread:$0]  %s211_s2, 512, %s395_s3, [#allocation4], %s331_s16, %s331_s16, %s332_s17  }
 0x118   :  { %324 = dma.done.wait [#allocation4], 512  }
 0x119   :  { %325 = vsyncadd [#allocation4], 4294966784 }
 0x11a   :  { %220 = vsyncpa [#allocation3], 1 }
 0x11b   :  { %221 = vsyncpa [#allocation4], 1 }

</bundles_post_ra>
